<compile_context>
chip_gen: v7x
topology: tpu7x:2x2x1
jax: 0.10.0
libtpu: 0.0.40
codegen_flags: <defaults>
</compile_context>

<pallas_src>
import functools

import jax
import jax.numpy as jnp
from jax import lax
from jax.experimental import pallas as pl
from jax.experimental.pallas import tpu as pltpu


def encoder_head_kernel(x_ref, w_ref, gamma_ref, beta_ref, out_ref, *, eps):
    # x_ref:     (B, K) f32   (cast to bf16 in-kernel, free on the VPU)
    # w_ref:     (K, L) bf16  (pre-cast once at init time)
    # gamma/beta:(1, L) f32
    # out_ref:   (B, L) f32   (single unmasked lane-dense store)

    # Linear (no bias -- cancelled by the batch-stat mean subtraction below).
    y = jnp.dot(x_ref[...].astype(jnp.bfloat16), w_ref[...],
                preferred_element_type=jnp.float32)                 # (B, L) f32

    # Train-mode BatchNorm1d: per-feature batch statistics (biased variance).
    mean = jnp.mean(y, axis=0, keepdims=True)                       # (1, L)
    var = jnp.mean(jnp.square(y - mean), axis=0, keepdims=True)     # (1, L)
    inv_std = lax.rsqrt(var + eps)                                  # EUP
    out_ref[...] = (y - mean) * inv_std * gamma_ref[...] + beta_ref[...]


def encoder_head(features, params, *, eps=1e-5):
    """features: (B, 2048) f32 -> (B, latent_dim) f32 (Linear + BatchNorm1d)."""
    B, K = features.shape
    Kw, L = params["w"].shape
    assert K == Kw

    kernel = functools.partial(encoder_head_kernel, eps=eps)

    # No grid: the whole problem fits comfortably in VMEM on v5e/v6e/v7x
    # (x 64 KiB f32 + W 512 KiB bf16 + out 4 KiB), so a single invocation with
    # full-array VMEM refs avoids all pipeline / accumulator overhead.
    vmem = lambda: pl.BlockSpec(memory_space=pltpu.MemorySpace.VMEM)
    return pl.pallas_call(
        kernel,
        out_shape=jax.ShapeDtypeStruct((B, L), jnp.float32),
        in_specs=[vmem(), vmem(), vmem(), vmem()],
        out_specs=vmem(),
    )(features, params["w"], params["gamma"], params["beta"])


def make_params(key, in_features, latent_dim):
    # Weight stored as bf16 once at init time (MXU-native; halves HBM bytes
    # for the dominant traffic and avoids a per-call wrapper cast).
    bound = 1.0 / jnp.sqrt(in_features)
    w = jax.random.uniform(key, (in_features, latent_dim), jnp.float32,
                           -bound, bound)
    return {
        "w": w.astype(jnp.bfloat16),
        "gamma": jnp.ones((1, latent_dim), jnp.float32),   # BN weight init
        "beta": jnp.zeros((1, latent_dim), jnp.float32),   # BN bias init
    }


def reference(features, params, eps=1e-5):
    # Same bf16-rounded operands / f32 accumulation as the kernel.
    y = jnp.dot(features.astype(jnp.bfloat16), params["w"],
                preferred_element_type=jnp.float32)
    mean = jnp.mean(y, axis=0, keepdims=True)
    var = jnp.mean(jnp.square(y - mean), axis=0, keepdims=True)
    return (y - mean) * lax.rsqrt(var + eps) * params["gamma"] + params["beta"]


if __name__ == "__main__":
    B = 8                    # batch
    in_features = 2048       # resnet50 fc.in_features (backbone output width)
    latent_dim = 128         # lane-dense latent dimension

    key = jax.random.PRNGKey(0)
    k_feat, k_par = jax.random.split(key, 2)

    # Stand-in for feature_extractor(x).view(B, -1); see TODO(synk) above.
    features = jax.random.normal(k_feat, (B, in_features), jnp.float32)
    params = make_params(k_par, in_features, latent_dim)

    out = jax.block_until_ready(encoder_head(features, params))

    ref = reference(features, params)
    assert out.shape == (B, latent_dim)
    assert jnp.allclose(out, ref, atol=1e-4, rtol=1e-3), (out, ref)
    print("KERNEL_OK")
</pallas_src>

<mosaic_0001>
module attributes {stable_mosaic.version = 11 : i64} {
  func.func @encoder_head_kernel(%arg0: memref<8x2048xf32, #tpu.memory_space<vmem>>, %arg1: memref<2048x128xbf16, #tpu.memory_space<vmem>>, %arg2: memref<1x128xf32, #tpu.memory_space<vmem>>, %arg3: memref<1x128xf32, #tpu.memory_space<vmem>>, %arg4: memref<8x128xf32, #tpu.memory_space<vmem>>) attributes {dimension_semantics = [], scalar_prefetch = 0 : i64, scratch_operands = 0 : i64, tpu.core_type = #tpu.core_type<tc>} {
    %c0 = arith.constant 0 : index
    %c0_0 = arith.constant 0 : index
    %0 = vector.load %arg0[%c0, %c0_0] : memref<8x2048xf32, #tpu.memory_space<vmem>>, vector<8x2048xf32>
    %1 = arith.truncf %0 : vector<8x2048xf32> to vector<8x2048xbf16>
    %c0_1 = arith.constant 0 : index
    %c0_2 = arith.constant 0 : index
    %2 = vector.load %arg1[%c0_1, %c0_2] : memref<2048x128xbf16, #tpu.memory_space<vmem>>, vector<2048x128xbf16>
    %cst = arith.constant dense<0.000000e+00> : vector<8x128xf32>
    %3 = tpu.matmul %1, %2, %cst {dimension_numbers = #tpu.dot_dimension_numbers<[1], [0], [0], [1], [0, 0, 1, 1], [], []>} : vector<8x2048xbf16>, vector<2048x128xbf16>, vector<8x128xf32> -> vector<8x128xf32>
    %cst_3 = arith.constant dense<0.000000e+00> : vector<128xf32>
    %4 = vector.multi_reduction <add>, %3, %cst_3 [0] : vector<8x128xf32> to vector<128xf32>
    %5 = vector.shape_cast %4 : vector<128xf32> to vector<1x128xf32>
    %cst_4 = arith.constant 8.000000e+00 : f32
    %6 = vector.broadcast %cst_4 : f32 to vector<1x128xf32>
    %7 = arith.divf %5, %6 : vector<1x128xf32>
    %8 = vector.broadcast %7 : vector<1x128xf32> to vector<8x128xf32>
    %9 = arith.subf %3, %8 : vector<8x128xf32>
    %10 = arith.mulf %9, %9 : vector<8x128xf32>
    %cst_5 = arith.constant dense<0.000000e+00> : vector<128xf32>
    %11 = vector.multi_reduction <add>, %10, %cst_5 [0] : vector<8x128xf32> to vector<128xf32>
    %12 = vector.shape_cast %11 : vector<128xf32> to vector<1x128xf32>
    %cst_6 = arith.constant 8.000000e+00 : f32
    %13 = vector.broadcast %cst_6 : f32 to vector<1x128xf32>
    %14 = arith.divf %12, %13 : vector<1x128xf32>
    %cst_7 = arith.constant 9.99999974E-6 : f32
    %15 = vector.broadcast %cst_7 : f32 to vector<1x128xf32>
    %16 = arith.addf %14, %15 : vector<1x128xf32>
    %17 = math.rsqrt %16 : vector<1x128xf32>
    %18 = vector.broadcast %7 : vector<1x128xf32> to vector<8x128xf32>
    %19 = arith.subf %3, %18 : vector<8x128xf32>
    %20 = vector.broadcast %17 : vector<1x128xf32> to vector<8x128xf32>
    %21 = arith.mulf %19, %20 : vector<8x128xf32>
    %c0_8 = arith.constant 0 : index
    %c0_9 = arith.constant 0 : index
    %22 = vector.load %arg2[%c0_8, %c0_9] : memref<1x128xf32, #tpu.memory_space<vmem>>, vector<1x128xf32>
    %23 = vector.broadcast %22 : vector<1x128xf32> to vector<8x128xf32>
    %24 = arith.mulf %21, %23 : vector<8x128xf32>
    %c0_10 = arith.constant 0 : index
    %c0_11 = arith.constant 0 : index
    %25 = vector.load %arg3[%c0_10, %c0_11] : memref<1x128xf32, #tpu.memory_space<vmem>>, vector<1x128xf32>
    %26 = vector.broadcast %25 : vector<1x128xf32> to vector<8x128xf32>
    %27 = arith.addf %24, %26 : vector<8x128xf32>
    %c0_12 = arith.constant 0 : index
    %c0_13 = arith.constant 0 : index
    %28 = vector.load %arg4[%c0_12, %c0_13] : memref<8x128xf32, #tpu.memory_space<vmem>>, vector<8x128xf32>
    tpu.vector_store %arg4[%c0_12, %c0_13], %27 {strides = array<i32>} : memref<8x128xf32, #tpu.memory_space<vmem>>, vector<8x128xf32>,
    return
  }
}

</mosaic_0001>

<bundles_post_ra>
// kernel: tpu_custom_call.1
= control target key start
LH: loop header
LB: loop body
LE: loop exit
PB: predicated region body
PF: predicated region fallthrough
CT: control target
= control target key end

     0   :  { %9 = vsyncpa [#allocation3], 0  ;;  %s2066_s0 = inlined_call_operand.hbm [shape: f32[8,2048], index: 0, kind: input, shape index: {}]   ;;  %s2067_s1 = inlined_call_operand.hbm [shape: bf16[2048,128], index: 1, kind: input, shape index: {}]   ;;  %s2068_s2 = inlined_call_operand.vmem [shape: f32[1,128], index: 2, kind: input, shape index: {}]   ;;  %s2069_s3 = inlined_call_operand.vmem [shape: f32[1,128], index: 3, kind: input, shape index: {}]   ;;  %s2070_s4 = inlined_call_operand.hbm [shape: f32[8,128], index: 4, kind: output, shape index: {}]  }
   0x1   :  { %10 = vsyncpa [#allocation6], 0 }
   0x2   :  { %11 = vsyncpa [#allocation4], 0  ;;  %s1987_s15 = smov [#allocation2]   ;;  %s1988_s17 = smov [#allocation5]  }
   0x3   :  { %s18_s16 = sshll.u32 %s1987_s15, 4  ;;  %s27_s18 = sshll.u32 %s1988_s17, 4  ;;  %s19_s16 = int_to_ptr.vmem [resolvable:$true] %s18_s16  ;;  %s2017_s18 = int_to_ptr.vmem [resolvable:$true] %s27_s18 }
   0x4   :  { %s1915_s21 = scalar_lea.hbm %s2066_s0, 2048 }
   0x5   :  { %p1916_p0 = scmp.ne.s32.totalorder %s2066_s0, %s1915_s21  ;;  %p1919_p1 = scmp.lt.u32.totalorder %s1915_s21, %s2066_s0 }
   0x7   :  { %p1921_p2 = pnand %p1919_p1, %p1916_p0 }
   0x9   :  { %1924 = shalt.err (!%p1921_p2)
}
   0xa   :  { %s1925_s26 = scalar_lea.vmem %s19_s16, 2048  ;;  %p1930_p4 = scmp.lt.s32.totalorder %s19_s16, %s19_s16 }
   0xb   :  { %p1926_p3 = scmp.ne.s32.totalorder %s19_s16, %s1925_s26  ;;  %p1931_p5 = scmp.lt.s32.totalorder %s1925_s26, %s1925_s26 }
   0xd   :  { %p1932_p6 = por %p1931_p5, %p1930_p4 }
   0xf   :  { %p1933_p7 = pnand %p1932_p6, %p1926_p3 }
  0x11   :  { %1936 = shalt.err (!%p1933_p7)
}
  0x12   :  { %21 = dma.hbm_to_vmem [thread:$0]  %s2066_s0, 2048, %s19_s16, [#allocation3]  }
  0x13   :  { %s1937_s5 = scalar_lea.hbm %s2067_s1, 16384 }
  0x14   :  { %p1938_p8 = scmp.ne.s32.totalorder %s2067_s1, %s1937_s5  ;;  %p1941_p9 = scmp.lt.u32.totalorder %s1937_s5, %s2067_s1 }
  0x16   :  { %p1943_p10 = pnand %p1941_p9, %p1938_p8 }
  0x18   :  { %1946 = shalt.err (!%p1943_p10)
}
  0x19   :  { %s1947_s10 = scalar_lea.vmem %s2017_s18, 16384  ;;  %p1952_p12 = scmp.lt.s32.totalorder %s2017_s18, %s2017_s18 }
  0x1a   :  { %p1948_p11 = scmp.ne.s32.totalorder %s2017_s18, %s1947_s10  ;;  %p1953_p13 = scmp.lt.s32.totalorder %s1947_s10, %s1947_s10 }
  0x1c   :  { %p1954_p0 = por %p1953_p13, %p1952_p12 }
  0x1e   :  { %p1955_p1 = pnand %p1954_p0, %p1948_p11 }
  0x20   :  { %1958 = shalt.err (!%p1955_p1)
}
  0x21   :  { %s1989_s0 = smov 64   ;;  %s1990_s11 = smov 4  }
  0x22   :  { %33 = dma.hbm_to_vmem [thread:$0]  %s2067_s1, 16384, %s2017_s18, [#allocation6], %s1989_s0, %s1989_s0, %s1990_s11  }
  0x23   :  { %1981 = dma.done.wait [#allocation3], 2048  }
  0x24   :  { %1982 = vsyncadd [#allocation3], 4294965248 }
  0x25   :  { %1983 = dma.done.wait [#allocation6], 16384  }
  0x26   :  { %1984 = vsyncadd [#allocation6], 4294950912  ;;  %v1785_v0 = vld [vmem:[#allocation5 + $0x40] sm:$0xff]   ;;  %v1789_v4 = vld [vmem:[#allocation5 + $0x48] sm:$0xff]   ;;  %s1991_s17 = smov [#allocation7]  }
  0x27   :  { %v1786_v1 = vld [vmem:[#allocation5 + $0xc0] sm:$0xff]   ;;  %1604 = vmatprep.subr.bf16.mxu0 %v1785_v0  ;;  %v1790_v5 = vld [vmem:[#allocation5 + $0xc8] sm:$0xff]   ;;  %v1793_v8 = vld [vmem:[#allocation5 + $0x50] sm:$0xff]   ;;  %s1464_s18 = sshll.u32 %s1991_s17, 4  ;;  %s1465_s18 = int_to_ptr.vmem [resolvable:$true] %s1464_s18 }
  0x28   :  { %v1787_v2 = vld [vmem:[#allocation5] sm:$0xff]   ;;  %1626 = vmatprep.subr.bf16.mxu1 %v1786_v1  ;;  %v1791_v6 = vld [vmem:[#allocation5 + $0x8] sm:$0xff]   ;;  %v1794_v9 = vld [vmem:[#allocation5 + $0xd0] sm:$0xff]   ;;  %s1959_s19 = scalar_lea.vmem %s1465_s18, 128  ;;  %p1964_p3 = scmp.lt.s32.totalorder %s1465_s18, %s1465_s18 }
  0x29   :  { %v1788_v3 = vld [vmem:[#allocation5 + $0x80] sm:$0xff]   ;;  %1605 = vmatpush3.bf16.msra.mxu0 %v1787_v2  ;;  %v1792_v7 = vld [vmem:[#allocation5 + $0x88] sm:$0xff]   ;;  %v1795_v10 = vld [vmem:[#allocation5 + $0x10] sm:$0xff]   ;;  %p1960_p2 = scmp.ne.s32.totalorder %s1465_s18, %s1959_s19  ;;  %p1965_p4 = scmp.lt.s32.totalorder %s1959_s19, %s1959_s19 }
  0x2a   :  { %1627 = vmatpush3.bf16.msra.mxu1 %v1788_v3  ;;  %1606 = vmatprep.subr.bf16.mxu0 %v1789_v4  ;;  %v1796_v11 = vld [vmem:[#allocation5 + $0x90] sm:$0xff]   ;;  %v1797_v12 = vld [vmem:[#allocation5 + $0x58] sm:$0xff]   ;;  %v1801_v16 = vld [vmem:[#allocation5 + $0x60] sm:$0xff]  }
  0x2b   :  { %1628 = vmatprep.subr.bf16.mxu1 %v1790_v5  ;;  %v1798_v13 = vld [vmem:[#allocation5 + $0xd8] sm:$0xff]   ;;  %v1802_v17 = vld [vmem:[#allocation5 + $0xe0] sm:$0xff]   ;;  %v1805_v20 = vld [vmem:[#allocation5 + $0x68] sm:$0xff]   ;;  %p1966_p5 = por %p1965_p4, %p1964_p3 }
  0x2c   :  { %v1799_v14 = vld [vmem:[#allocation5 + $0x18] sm:$0xff]   ;;  %v1803_v18 = vld [vmem:[#allocation5 + $0x20] sm:$0xff]   ;;  %v1806_v21 = vld [vmem:[#allocation5 + $0xe8] sm:$0xff]  }
  0x2d   :  { %1607 = vmatpush3.bf16.msra.mxu0 %v1791_v6  ;;  %v1800_v15 = vld [vmem:[#allocation5 + $0x98] sm:$0xff]   ;;  %v1804_v19 = vld [vmem:[#allocation5 + $0xa0] sm:$0xff]   ;;  %v1807_v22 = vld [vmem:[#allocation5 + $0x28] sm:$0xff]   ;;  %p1967_p6 = pnand %p1966_p5, %p1960_p2 }
  0x2e   :  { %1629 = vmatpush3.bf16.msra.mxu1 %v1792_v7  ;;  %1608 = vmatprep.subr.bf16.mxu0 %v1793_v8  ;;  %v1808_v23 = vld [vmem:[#allocation5 + $0xa8] sm:$0xff]   ;;  %v1809_v24 = vld [vmem:[#allocation5 + $0x70] sm:$0xff]   ;;  %v1813_v28 = vld [vmem:[#allocation5 + $0x78] sm:$0xff]  }
  0x2f   :  { %1630 = vmatprep.subr.bf16.mxu1 %v1794_v9  ;;  %v1810_v25 = vld [vmem:[#allocation5 + $0xf0] sm:$0xff]   ;;  %v1814_v29 = vld [vmem:[#allocation5 + $0xf8] sm:$0xff]   ;;  %v46_v32 = vld [vmem:[#allocation2 + $0x8] sm:$0xff] }
  0x30   :  { %v1811_v26 = vld [vmem:[#allocation5 + $0x30] sm:$0xff]   ;;  %v1815_v30 = vld [vmem:[#allocation5 + $0x38] sm:$0xff]   ;;  %v45_v34 = vld [vmem:[#allocation2] sm:$0xff]  ;;  %v62_v35 = vpack.c.bf16 %v46_v32, %v46_v32 }
  0x31   :  { %1609 = vmatpush3.bf16.msra.mxu0 %v1795_v10  ;;  %v1812_v27 = vld [vmem:[#allocation5 + $0xb0] sm:$0xff]   ;;  %v1816_v31 = vld [vmem:[#allocation5 + $0xb8] sm:$0xff]   ;;  %v61_v37 = vpack.c.bf16 %v45_v34, %v45_v34  ;;  %v1817_v40 = vld [vmem:[#allocation5 + $0x140] sm:$0xff]  }
  0x32   :  { %1631 = vmatpush3.bf16.msra.mxu1 %v1796_v11  ;;  %1610 = vmatprep.subr.bf16.mxu0 %v1797_v12  ;;  %v48_v33 = vld [vmem:[#allocation2 + $0x18] sm:$0xff]  ;;  %v47_v38 = vld [vmem:[#allocation2 + $0x10] sm:$0xff]  ;;  %v1818_v41 = vld [vmem:[#allocation5 + $0x1c0] sm:$0xff]  }
  0x33   :  { %1632 = vmatprep.subr.bf16.mxu1 %v1798_v13  ;;  %v64_v36 = vpack.c.bf16 %v48_v33, %v48_v33  ;;  %v63_v39 = vpack.c.bf16 %v47_v38, %v47_v38  ;;  %1133 = vmatprep.mubr.bf16.mxu0 %v62_v35  ;;  %v1819_v42 = vld [vmem:[#allocation5 + $0x100] sm:$0xff]   ;;  %v1821_v44 = vld [vmem:[#allocation5 + $0x148] sm:$0xff]   ;;  %v1825_v48 = vld [vmem:[#allocation5 + $0x150] sm:$0xff]  }
  0x34   :  { %v1820_v43 = vld [vmem:[#allocation5 + $0x180] sm:$0xff]   ;;  %v1822_v45 = vld [vmem:[#allocation5 + $0x1c8] sm:$0xff]   ;;  %v1826_v49 = vld [vmem:[#allocation5 + $0x1d0] sm:$0xff]  }
  0x35   :  { %1611 = vmatpush3.bf16.msra.mxu0 %v1799_v14  ;;  %1173 = vmatprep.mubr.bf16.mxu1 %v64_v36  ;;  %v1823_v46 = vld [vmem:[#allocation5 + $0x108] sm:$0xff]   ;;  %v1827_v50 = vld [vmem:[#allocation5 + $0x110] sm:$0xff]   ;;  %v1829_v52 = vld [vmem:[#allocation5 + $0x158] sm:$0xff]  }
  0x36   :  { %1633 = vmatpush3.bf16.msra.mxu1 %v1800_v15  ;;  %1612 = vmatprep.subr.bf16.mxu0 %v1801_v16  ;;  %v1824_v47 = vld [vmem:[#allocation5 + $0x188] sm:$0xff]   ;;  %v1828_v51 = vld [vmem:[#allocation5 + $0x190] sm:$0xff]   ;;  %v1830_v53 = vld [vmem:[#allocation5 + $0x1d8] sm:$0xff]  }
  0x37   :  { %1634 = vmatprep.subr.bf16.mxu1 %v1802_v17  ;;  %v1831_v54 = vld [vmem:[#allocation5 + $0x118] sm:$0xff]   ;;  %v1833_v56 = vld [vmem:[#allocation5 + $0x160] sm:$0xff]   ;;  %v1837_v60 = vld [vmem:[#allocation5 + $0x168] sm:$0xff]  }
  0x38   :  { %v1832_v55 = vld [vmem:[#allocation5 + $0x198] sm:$0xff]   ;;  %v1834_v57 = vld [vmem:[#allocation5 + $0x1e0] sm:$0xff]   ;;  %v1838_v61 = vld [vmem:[#allocation5 + $0x1e8] sm:$0xff]  }
  0x39   :  { %1613 = vmatpush3.bf16.msra.mxu0 %v1803_v18  ;;  %v1835_v58 = vld [vmem:[#allocation5 + $0x120] sm:$0xff]   ;;  %v1839_v62 = vld [vmem:[#allocation5 + $0x128] sm:$0xff]   ;;  %v1841_v0 = vld [vmem:[#allocation5 + $0x170] sm:$0xff]  }
  0x3a   :  { %1635 = vmatpush3.bf16.msra.mxu1 %v1804_v19  ;;  %1614 = vmatprep.subr.bf16.mxu0 %v1805_v20  ;;  %v1836_v59 = vld [vmem:[#allocation5 + $0x1a0] sm:$0xff]   ;;  %v1840_v63 = vld [vmem:[#allocation5 + $0x1a8] sm:$0xff]   ;;  %v1842_v1 = vld [vmem:[#allocation5 + $0x1f0] sm:$0xff]  }
  0x3b   :  { %1636 = vmatprep.subr.bf16.mxu1 %v1806_v21  ;;  %v1843_v2 = vld [vmem:[#allocation5 + $0x130] sm:$0xff]   ;;  %v1845_v4 = vld [vmem:[#allocation5 + $0x178] sm:$0xff]   ;;  %v50_v8 = vld [vmem:[#allocation2 + $0x28] sm:$0xff] }
  0x3c   :  { %v1844_v3 = vld [vmem:[#allocation5 + $0x1b0] sm:$0xff]   ;;  %v1846_v5 = vld [vmem:[#allocation5 + $0x1f8] sm:$0xff]   ;;  %v66_v10 = vpack.c.bf16 %v50_v8, %v50_v8  ;;  %v49_v12 = vld [vmem:[#allocation2 + $0x20] sm:$0xff] }
  0x3d   :  { %1615 = vmatpush3.bf16.msra.mxu0 %v1807_v22  ;;  %v1847_v6 = vld [vmem:[#allocation5 + $0x138] sm:$0xff]   ;;  %v51_v13 = vld [vmem:[#allocation2 + $0x30] sm:$0xff]  ;;  %v65_v14 = vpack.c.bf16 %v49_v12, %v49_v12  ;;  %v1849_v16 = vld [vmem:[#allocation5 + $0x240] sm:$0xff]  }
  0x3e   :  { %1637 = vmatpush3.bf16.msra.mxu1 %v1808_v23  ;;  %1616 = vmatprep.subr.bf16.mxu0 %v1809_v24  ;;  %v1848_v7 = vld [vmem:[#allocation5 + $0x1b8] sm:$0xff]   ;;  %v67_v15 = vpack.c.bf16 %v51_v13, %v51_v13  ;;  %v1850_v17 = vld [vmem:[#allocation5 + $0x2c0] sm:$0xff]   ;;  %v1853_v20 = vld [vmem:[#allocation5 + $0x248] sm:$0xff]  }
  0x3f   :  { %1638 = vmatprep.subr.bf16.mxu1 %v1810_v25  ;;  %v52_v9 = vld [vmem:[#allocation2 + $0x38] sm:$0xff]  ;;  %v1851_v18 = vld [vmem:[#allocation5 + $0x200] sm:$0xff]   ;;  %v1854_v21 = vld [vmem:[#allocation5 + $0x2c8] sm:$0xff]  }
  0x40   :  { %v68_v11 = vpack.c.bf16 %v52_v9, %v52_v9  ;;  %v1852_v19 = vld [vmem:[#allocation5 + $0x280] sm:$0xff]   ;;  %v1855_v22 = vld [vmem:[#allocation5 + $0x208] sm:$0xff]   ;;  %v1857_v24 = vld [vmem:[#allocation5 + $0x250] sm:$0xff]  }
  0x41   :  { %1617 = vmatpush3.bf16.msra.mxu0 %v1811_v26  ;;  %v1856_v23 = vld [vmem:[#allocation5 + $0x288] sm:$0xff]   ;;  %v1858_v25 = vld [vmem:[#allocation5 + $0x2d0] sm:$0xff]   ;;  %v1865_v32 = vld [vmem:[#allocation5 + $0x260] sm:$0xff]  }
  0x42   :  { %1639 = vmatpush3.bf16.msra.mxu1 %v1812_v27  ;;  %1618 = vmatprep.subr.bf16.mxu0 %v1813_v28  ;;  %v1859_v26 = vld [vmem:[#allocation5 + $0x210] sm:$0xff]   ;;  %v1861_v28 = vld [vmem:[#allocation5 + $0x258] sm:$0xff]   ;;  %v1866_v33 = vld [vmem:[#allocation5 + $0x2e0] sm:$0xff]  }
  0x43   :  { %1640 = vmatprep.subr.bf16.mxu1 %v1814_v29  ;;  %v1860_v27 = vld [vmem:[#allocation5 + $0x290] sm:$0xff]   ;;  %v1862_v29 = vld [vmem:[#allocation5 + $0x2d8] sm:$0xff]   ;;  %v1867_v34 = vld [vmem:[#allocation5 + $0x220] sm:$0xff]  }
  0x44   :  { %v1868_v35 = vld [vmem:[#allocation5 + $0x2a0] sm:$0xff]   ;;  %v1869_v36 = vld [vmem:[#allocation5 + $0x268] sm:$0xff]  }
  0x45   :  { %1619 = vmatpush3.bf16.msra.mxu0 %v1815_v30  ;;  %v1863_v30 = vld [vmem:[#allocation5 + $0x218] sm:$0xff]   ;;  %v1871_v38 = vld [vmem:[#allocation5 + $0x228] sm:$0xff]   ;;  %v1897_v8 = vld [vmem:[#allocation5 + $0x360] sm:$0xff]  }
  0x46   :  { %1641 = vmatpush3.bf16.msra.mxu1 %v1816_v31  ;;  %1648 = vmatprep.subr.bf16.mxu0 %v1817_v40  ;;  %v1864_v31 = vld [vmem:[#allocation5 + $0x298] sm:$0xff]   ;;  %v1873_v40 = vld [vmem:[#allocation5 + $0x270] sm:$0xff]   ;;  %v1898_v9 = vld [vmem:[#allocation5 + $0x3e0] sm:$0xff]  }
  0x47   :  { %1670 = vmatprep.subr.bf16.mxu1 %v1818_v41  ;;  %v1874_v41 = vld [vmem:[#allocation5 + $0x2f0] sm:$0xff]   ;;  %v1901_v12 = vld [vmem:[#allocation5 + $0x368] sm:$0xff]  }
  0x48   :  { %1134 = vmatmul.mubr.bf16.vlgmr.msra.gmra.mrb[0].mxu0 %v61_v37  ;;  %v1870_v37 = vld [vmem:[#allocation5 + $0x2e8] sm:$0xff]  }
  0x49   :  { %1174 = vmatmul.mubr.bf16.vlgmr.msra.gmra.mrb[0].mxu1 %v63_v39  ;;  %1649 = vmatpush3.bf16.msra.mxu0 %v1819_v42  ;;  %v1872_v39 = vld [vmem:[#allocation5 + $0x2a8] sm:$0xff]   ;;  %v1875_v42 = vld [vmem:[#allocation5 + $0x230] sm:$0xff]  }
  0x4a   :  { %1671 = vmatpush3.bf16.msra.mxu1 %v1820_v43  ;;  %1650 = vmatprep.subr.bf16.mxu0 %v1821_v44  ;;  %v1876_v43 = vld [vmem:[#allocation5 + $0x2b0] sm:$0xff]   ;;  %v1877_v44 = vld [vmem:[#allocation5 + $0x278] sm:$0xff]   ;;  %v1902_v13 = vld [vmem:[#allocation5 + $0x3e8] sm:$0xff]  }
  0x4b   :  { %1672 = vmatprep.subr.bf16.mxu1 %v1822_v45  ;;  %1213 = vmatprep.mubr.bf16.mxu0 %v66_v10  ;;  %v1878_v45 = vld [vmem:[#allocation5 + $0x2f8] sm:$0xff]   ;;  %v1899_v10 = vld [vmem:[#allocation5 + $0x320] sm:$0xff]  }
  0x4c   :  { %1253 = vmatprep.mubr.bf16.mxu1 %v68_v11  ;;  %v1900_v11 = vld [vmem:[#allocation5 + $0x3a0] sm:$0xff]  }
  0x4d   :  { %1651 = vmatpush3.bf16.msra.mxu0 %v1823_v46  ;;  %v1879_v46 = vld [vmem:[#allocation5 + $0x238] sm:$0xff]  }
  0x4e   :  { %1673 = vmatpush3.bf16.msra.mxu1 %v1824_v47  ;;  %1652 = vmatprep.subr.bf16.mxu0 %v1825_v48  ;;  %v1880_v47 = vld [vmem:[#allocation5 + $0x2b8] sm:$0xff]   ;;  %v54_v48 = vld [vmem:[#allocation2 + $0x48] sm:$0xff] }
  0x4f   :  { %1674 = vmatprep.subr.bf16.mxu1 %v1826_v49  ;;  %v70_v49 = vpack.c.bf16 %v54_v48, %v54_v48 }
  0x51   :  { %1653 = vmatpush3.bf16.msra.mxu0 %v1827_v50  ;;  %v56_v50 = vld [vmem:[#allocation2 + $0x58] sm:$0xff] }
  0x52   :  { %1675 = vmatpush3.bf16.msra.mxu1 %v1828_v51  ;;  %1654 = vmatprep.subr.bf16.mxu0 %v1829_v52  ;;  %v53_v51 = vld [vmem:[#allocation2 + $0x40] sm:$0xff]  ;;  %v55_v52 = vld [vmem:[#allocation2 + $0x50] sm:$0xff] }
  0x53   :  { %1676 = vmatprep.subr.bf16.mxu1 %v1830_v53  ;;  %v72_v53 = vpack.c.bf16 %v56_v50, %v56_v50 }
  0x55   :  { %1655 = vmatpush3.bf16.msra.mxu0 %v1831_v54  ;;  %v69_v54 = vpack.c.bf16 %v53_v51, %v53_v51 }
  0x56   :  { %1677 = vmatpush3.bf16.msra.mxu1 %v1832_v55  ;;  %1656 = vmatprep.subr.bf16.mxu0 %v1833_v56  ;;  %v71_v55 = vpack.c.bf16 %v55_v52, %v55_v52  ;;  %v1881_v56 = vld [vmem:[#allocation5 + $0x340] sm:$0xff]  }
  0x57   :  { %1678 = vmatprep.subr.bf16.mxu1 %v1834_v57  ;;  %v1882_v57 = vld [vmem:[#allocation5 + $0x3c0] sm:$0xff]  }
  0x59   :  { %1657 = vmatpush3.bf16.msra.mxu0 %v1835_v58  ;;  %v1883_v58 = vld [vmem:[#allocation5 + $0x300] sm:$0xff]  }
  0x5a   :  { %1679 = vmatpush3.bf16.msra.mxu1 %v1836_v59  ;;  %1658 = vmatprep.subr.bf16.mxu0 %v1837_v60  ;;  %v1884_v59 = vld [vmem:[#allocation5 + $0x380] sm:$0xff]   ;;  %v1885_v60 = vld [vmem:[#allocation5 + $0x348] sm:$0xff]  }
  0x5b   :  { %1680 = vmatprep.subr.bf16.mxu1 %v1838_v61  ;;  %v1886_v61 = vld [vmem:[#allocation5 + $0x3c8] sm:$0xff]  }
  0x5d   :  { %1659 = vmatpush3.bf16.msra.mxu0 %v1839_v62  ;;  %v1887_v62 = vld [vmem:[#allocation5 + $0x308] sm:$0xff]  }
  0x5e   :  { %1681 = vmatpush3.bf16.msra.mxu1 %v1840_v63  ;;  %1660 = vmatprep.subr.bf16.mxu0 %v1841_v0  ;;  %v1888_v63 = vld [vmem:[#allocation5 + $0x388] sm:$0xff]   ;;  %v1889_v0 = vld [vmem:[#allocation5 + $0x350] sm:$0xff]  }
  0x5f   :  { %1682 = vmatprep.subr.bf16.mxu1 %v1842_v1  ;;  %v1890_v1 = vld [vmem:[#allocation5 + $0x3d0] sm:$0xff]  }
  0x61   :  { %1661 = vmatpush3.bf16.msra.mxu0 %v1843_v2  ;;  %v1891_v2 = vld [vmem:[#allocation5 + $0x310] sm:$0xff]  }
  0x62   :  { %1683 = vmatpush3.bf16.msra.mxu1 %v1844_v3  ;;  %1662 = vmatprep.subr.bf16.mxu0 %v1845_v4  ;;  %v1892_v3 = vld [vmem:[#allocation5 + $0x390] sm:$0xff]   ;;  %v1893_v4 = vld [vmem:[#allocation5 + $0x358] sm:$0xff]  }
  0x63   :  { %1684 = vmatprep.subr.bf16.mxu1 %v1846_v5  ;;  %v1894_v5 = vld [vmem:[#allocation5 + $0x3d8] sm:$0xff]  }
  0x65   :  { %1663 = vmatpush3.bf16.msra.mxu0 %v1847_v6  ;;  %v1895_v6 = vld [vmem:[#allocation5 + $0x318] sm:$0xff]  }
  0x66   :  { %1685 = vmatpush3.bf16.msra.mxu1 %v1848_v7  ;;  %1692 = vmatprep.subr.bf16.mxu0 %v1849_v16  ;;  %v1896_v7 = vld [vmem:[#allocation5 + $0x398] sm:$0xff]   ;;  %v1905_v16 = vld [vmem:[#allocation5 + $0x370] sm:$0xff]  }
  0x67   :  { %1714 = vmatprep.subr.bf16.mxu1 %v1850_v17  ;;  %v1906_v17 = vld [vmem:[#allocation5 + $0x3f0] sm:$0xff]  }
  0x68   :  { %1214 = vmatmul.mubr.bf16.vlgmr.msra.gmra.mrb[4].mxu0 %v65_v14  ;;  %v1903_v14 = vld [vmem:[#allocation5 + $0x328] sm:$0xff]  }
  0x69   :  { %1254 = vmatmul.mubr.bf16.vlgmr.msra.gmra.mrb[4].mxu1 %v67_v15  ;;  %1693 = vmatpush3.bf16.msra.mxu0 %v1851_v18  ;;  %v1904_v15 = vld [vmem:[#allocation5 + $0x3a8] sm:$0xff]   ;;  %v1907_v18 = vld [vmem:[#allocation5 + $0x330] sm:$0xff]  }
  0x6a   :  { %1715 = vmatpush3.bf16.msra.mxu1 %v1852_v19  ;;  %1694 = vmatprep.subr.bf16.mxu0 %v1853_v20  ;;  %v1908_v19 = vld [vmem:[#allocation5 + $0x3b0] sm:$0xff]   ;;  %v1909_v20 = vld [vmem:[#allocation5 + $0x378] sm:$0xff]  }
  0x6b   :  { %1716 = vmatprep.subr.bf16.mxu1 %v1854_v21  ;;  %1293 = vmatprep.mubr.bf16.mxu0 %v70_v49  ;;  %v1910_v21 = vld [vmem:[#allocation5 + $0x3f8] sm:$0xff]  }
  0x6c   :  { %1333 = vmatprep.mubr.bf16.mxu1 %v72_v53 }
  0x6d   :  { %1695 = vmatpush3.bf16.msra.mxu0 %v1855_v22  ;;  %v1911_v22 = vld [vmem:[#allocation5 + $0x338] sm:$0xff]  }
  0x6e   :  { %1717 = vmatpush3.bf16.msra.mxu1 %v1856_v23  ;;  %1696 = vmatprep.subr.bf16.mxu0 %v1857_v24  ;;  %v1912_v23 = vld [vmem:[#allocation5 + $0x3b8] sm:$0xff]   ;;  %v58_v24 = vld [vmem:[#allocation2 + $0x68] sm:$0xff] }
  0x6f   :  { %1718 = vmatprep.subr.bf16.mxu1 %v1858_v25  ;;  %v60_v25 = vld [vmem:[#allocation2 + $0x78] sm:$0xff] }
  0x71   :  { %1697 = vmatpush3.bf16.msra.mxu0 %v1859_v26  ;;  %v57_v26 = vld [vmem:[#allocation2 + $0x60] sm:$0xff] }
  0x72   :  { %1719 = vmatpush3.bf16.msra.mxu1 %v1860_v27  ;;  %1698 = vmatprep.subr.bf16.mxu0 %v1861_v28  ;;  %v74_v27 = vpack.c.bf16 %v58_v24, %v58_v24  ;;  %v76_v28 = vpack.c.bf16 %v60_v25, %v60_v25 }
  0x73   :  { %1720 = vmatprep.subr.bf16.mxu1 %v1862_v29  ;;  %v73_v29 = vpack.c.bf16 %v57_v26, %v57_v26 }
  0x75   :  { %1699 = vmatpush3.bf16.msra.mxu0 %v1863_v30  ;;  %v59_v30 = vld [vmem:[#allocation2 + $0x70] sm:$0xff] }
  0x76   :  { %1721 = vmatpush3.bf16.msra.mxu1 %v1864_v31  ;;  %1700 = vmatprep.subr.bf16.mxu0 %v1865_v32  ;;  %v75_v31 = vpack.c.bf16 %v59_v30, %v59_v30 }
  0x77   :  { %1722 = vmatprep.subr.bf16.mxu1 %v1866_v33 }
  0x79   :  { %1701 = vmatpush3.bf16.msra.mxu0 %v1867_v34 }
  0x7a   :  { %1723 = vmatpush3.bf16.msra.mxu1 %v1868_v35  ;;  %1702 = vmatprep.subr.bf16.mxu0 %v1869_v36 }
  0x7b   :  { %1724 = vmatprep.subr.bf16.mxu1 %v1870_v37 }
  0x7d   :  { %1703 = vmatpush3.bf16.msra.mxu0 %v1871_v38 }
  0x7e   :  { %1725 = vmatpush3.bf16.msra.mxu1 %v1872_v39  ;;  %1704 = vmatprep.subr.bf16.mxu0 %v1873_v40 }
  0x7f   :  { %1726 = vmatprep.subr.bf16.mxu1 %v1874_v41 }
  0x81   :  { %1705 = vmatpush3.bf16.msra.mxu0 %v1875_v42 }
  0x82   :  { %1727 = vmatpush3.bf16.msra.mxu1 %v1876_v43  ;;  %1706 = vmatprep.subr.bf16.mxu0 %v1877_v44 }
  0x83   :  { %1728 = vmatprep.subr.bf16.mxu1 %v1878_v45 }
  0x85   :  { %1707 = vmatpush3.bf16.msra.mxu0 %v1879_v46 }
  0x86   :  { %1729 = vmatpush3.bf16.msra.mxu1 %v1880_v47  ;;  %1736 = vmatprep.subr.bf16.mxu0 %v1881_v56 }
  0x87   :  { %1758 = vmatprep.subr.bf16.mxu1 %v1882_v57 }
  0x88   :  { %1294 = vmatmul.mubr.bf16.vlgmr.msra.gmra.mrb[8].mxu0 %v69_v54 }
  0x89   :  { %1334 = vmatmul.mubr.bf16.vlgmr.msra.gmra.mrb[8].mxu1 %v71_v55  ;;  %1737 = vmatpush3.bf16.msra.mxu0 %v1883_v58 }
  0x8a   :  { %1759 = vmatpush3.bf16.msra.mxu1 %v1884_v59  ;;  %1738 = vmatprep.subr.bf16.mxu0 %v1885_v60 }
  0x8b   :  { %1760 = vmatprep.subr.bf16.mxu1 %v1886_v61  ;;  %1373 = vmatprep.mubr.bf16.mxu0 %v74_v27 }
  0x8c   :  { %1413 = vmatprep.mubr.bf16.mxu1 %v76_v28 }
  0x8d   :  { %1739 = vmatpush3.bf16.msra.mxu0 %v1887_v62 }
  0x8e   :  { %1761 = vmatpush3.bf16.msra.mxu1 %v1888_v63  ;;  %1740 = vmatprep.subr.bf16.mxu0 %v1889_v0 }
  0x8f   :  { %1762 = vmatprep.subr.bf16.mxu1 %v1890_v1 }
  0x91   :  { %1741 = vmatpush3.bf16.msra.mxu0 %v1891_v2 }
  0x92   :  { %1763 = vmatpush3.bf16.msra.mxu1 %v1892_v3  ;;  %1742 = vmatprep.subr.bf16.mxu0 %v1893_v4 }
  0x93   :  { %1764 = vmatprep.subr.bf16.mxu1 %v1894_v5 }
  0x95   :  { %1743 = vmatpush3.bf16.msra.mxu0 %v1895_v6 }
  0x96   :  { %1765 = vmatpush3.bf16.msra.mxu1 %v1896_v7  ;;  %1744 = vmatprep.subr.bf16.mxu0 %v1897_v8 }
  0x97   :  { %1766 = vmatprep.subr.bf16.mxu1 %v1898_v9 }
  0x99   :  { %1745 = vmatpush3.bf16.msra.mxu0 %v1899_v10 }
  0x9a   :  { %1767 = vmatpush3.bf16.msra.mxu1 %v1900_v11  ;;  %1746 = vmatprep.subr.bf16.mxu0 %v1901_v12 }
  0x9b   :  { %1768 = vmatprep.subr.bf16.mxu1 %v1902_v13 }
  0x9d   :  { %1747 = vmatpush3.bf16.msra.mxu0 %v1903_v14 }
  0x9e   :  { %1769 = vmatpush3.bf16.msra.mxu1 %v1904_v15  ;;  %1748 = vmatprep.subr.bf16.mxu0 %v1905_v16 }
  0x9f   :  { %1770 = vmatprep.subr.bf16.mxu1 %v1906_v17 }
  0xa1   :  { %1749 = vmatpush3.bf16.msra.mxu0 %v1907_v18 }
  0xa2   :  { %1771 = vmatpush3.bf16.msra.mxu1 %v1908_v19  ;;  %1750 = vmatprep.subr.bf16.mxu0 %v1909_v20 }
  0xa3   :  { %1772 = vmatprep.subr.bf16.mxu1 %v1910_v21 }
  0xa5   :  { %1751 = vmatpush3.bf16.msra.mxu0 %v1911_v22 }
  0xa6   :  { %1773 = vmatpush3.bf16.msra.mxu1 %v1912_v23 }
  0xa8   :  { %1374 = vmatmul.mubr.bf16.vlgmr.msra.gmra.mrb[12].mxu0 %v73_v29 }
  0xa9   :  { %1414 = vmatmul.mubr.bf16.vlgmr.msra.gmra.mrb[12].mxu1 %v75_v31 }
 0x11b   :  { %v1620_v32 = vpop.f32.mrb[0].mxu0 }
 0x11c   :  { %v1642_v33 = vpop.f32.mrb[0].mxu1  ;;  %v1621_v34 = vpop.f32.mrb[1].mxu0 }
 0x11d   :  { %v1643_v35 = vpop.f32.mrb[1].mxu1  ;;  %v1622_v36 = vadd.f32 %v1621_v34, %v1620_v32  ;;  %v1623_v38 = vpop.f32.mrb[2].mxu0 }
 0x11e   :  { %v1644_v37 = vadd.f32 %v1643_v35, %v1642_v33  ;;  %v1645_v39 = vpop.f32.mrb[2].mxu1  ;;  %v1624_v40 = vpop.f32.mrb[3].mxu0  ;;  %v1602_v33 = vld [vmem:[%s2068_s2] ss:$0 sm:$0xff] }
 0x11f   :  { %v1646_v41 = vpop.f32.mrb[3].mxu1  ;;  %v1603_v35 = vld [vmem:[%s2069_s3] ss:$0 sm:$0xff] }
 0x120   :  { %v1176_v42 = vadd.f32 %v1644_v37, %v1622_v36 }
 0x13b   :  { %v1664_v43 = vpop.f32.mrb[4].mxu0 }
 0x13c   :  { %v1686_v44 = vpop.f32.mrb[4].mxu1  ;;  %v1665_v45 = vpop.f32.mrb[5].mxu0 }
 0x13d   :  { %v1666_v46 = vadd.f32 %v1665_v45, %v1664_v43  ;;  %v1687_v47 = vpop.f32.mrb[5].mxu1  ;;  %v1667_v48 = vpop.f32.mrb[6].mxu0 }
 0x13e   :  { %v1688_v49 = vadd.f32 %v1687_v47, %v1686_v44  ;;  %v1689_v50 = vpop.f32.mrb[6].mxu1  ;;  %v1668_v51 = vpop.f32.mrb[7].mxu0 }
 0x13f   :  { %v1216_v52 = vadd.f32 %v1666_v46, %v1176_v42  ;;  %v1690_v53 = vpop.f32.mrb[7].mxu1 }
 0x141   :  { %v1256_v54 = vadd.f32 %v1688_v49, %v1216_v52 }
 0x15b   :  { %v1708_v55 = vpop.f32.mrb[8].mxu0 }
 0x15c   :  { %v1730_v56 = vpop.f32.mrb[8].mxu1  ;;  %v1709_v57 = vpop.f32.mrb[9].mxu0 }
 0x15d   :  { %v1710_v58 = vadd.f32 %v1709_v57, %v1708_v55  ;;  %v1731_v59 = vpop.f32.mrb[9].mxu1  ;;  %v1711_v60 = vpop.f32.mrb[10].mxu0 }
 0x15e   :  { %v1732_v61 = vadd.f32 %v1731_v59, %v1730_v56  ;;  %v1733_v62 = vpop.f32.mrb[10].mxu1  ;;  %v1712_v63 = vpop.f32.mrb[11].mxu0 }
 0x15f   :  { %v1296_v0 = vadd.f32 %v1710_v58, %v1256_v54  ;;  %v1734_v1 = vpop.f32.mrb[11].mxu1 }
 0x161   :  { %v1336_v2 = vadd.f32 %v1732_v61, %v1296_v0 }
 0x17b   :  { %v1752_v3 = vpop.f32.mrb[12].mxu0 }
 0x17c   :  { %v1774_v4 = vpop.f32.mrb[12].mxu1  ;;  %v1753_v5 = vpop.f32.mrb[13].mxu0 }
 0x17d   :  { %v1775_v6 = vpop.f32.mrb[13].mxu1  ;;  %v1754_v7 = vadd.f32 %v1753_v5, %v1752_v3  ;;  %v1755_v9 = vpop.f32.mrb[14].mxu0 }
 0x17e   :  { %v1776_v8 = vadd.f32 %v1775_v6, %v1774_v4  ;;  %v1777_v10 = vpop.f32.mrb[14].mxu1  ;;  %v1756_v11 = vpop.f32.mrb[15].mxu0 }
 0x17f   :  { %v1778_v12 = vpop.f32.mrb[15].mxu1  ;;  %v1376_v13 = vadd.f32 %v1754_v7, %v1336_v2 }
 0x181   :  { %v1416_v14 = vadd.f32 %v1776_v8, %v1376_v13 }
 0x183   :  { %v1421_v15 = vrot.slane %v1416_v14, 4 }
 0x185   :  { %v1422_v16 = vadd.f32 %v1421_v15, %v1416_v14 }
 0x187   :  { %v1423_v17 = vrot.slane %v1422_v16, 2 }
 0x189   :  { %v1424_v18 = vadd.f32 %v1423_v17, %v1422_v16 }
 0x18b   :  { %v1425_v19 = vrot.slane %v1424_v18, 1 }
 0x18d   :  { %v1426_v20 = vadd.f32 %v1425_v19, %v1424_v18 }
 0x18f   :  { %v1428_v21 = vmul.f32 0.125, %v1426_v20 }
 0x191   :  { %v1429_v22 = vsub.f32 %v1416_v14, %v1428_v21 }
 0x193   :  { %v1430_v23 = vmul.f32 %v1429_v22, %v1429_v22 }
 0x195   :  { %v1431_v24 = vrot.slane %v1430_v23, 4 }
 0x197   :  { %v1432_v25 = vadd.f32 %v1431_v24, %v1430_v23 }
 0x199   :  { %v1433_v26 = vrot.slane %v1432_v25, 2 }
 0x19b   :  { %v1434_v27 = vadd.f32 %v1433_v26, %v1432_v25 }
 0x19d   :  { %v1435_v28 = vrot.slane %v1434_v27, 1 }
 0x19f   :  { %v1436_v29 = vadd.f32 %v1435_v28, %v1434_v27 }
 0x1a1   :  { %v1437_v30 = vmul.f32 0.125, %v1436_v29 }
 0x1a3   :  { %v1438_v31 = vadd.f32 1e-05, %v1437_v30 }
 0x1a5   :  { %1913 = vrsqrt.f32 %v1438_v31 }
 0x1af   :  { %v1914_v32 = vpop.eup %1913 }
 0x1b0   :  { %v1440_v34 = vmul.f32 %v1914_v32, %v1429_v22 }
 0x1b2   :  { %v1448_v36 = vmul.f32 %v1602_v33, %v1440_v34 }
 0x1b4   :  { %v1456_v37 = vadd.f32 %v1603_v35, %v1448_v36 }
 0x1b6   :  { %1457 = vst [vmem:[#allocation7] sm:$0xff] %v1456_v37 }
 0x1b7   :  { %1970 = shalt.err (!%p1967_p6)
}
 0x1b8   :  { %s1971_s21 = scalar_lea.hbm %s2070_s4, 128 }
 0x1b9   :  { %p1972_p7 = scmp.ne.s32.totalorder %s2070_s4, %s1971_s21  ;;  %p1975_p8 = scmp.lt.u32.totalorder %s1971_s21, %s2070_s4 }
 0x1bb   :  { %p1977_p9 = pnand %p1975_p8, %p1972_p7 }
 0x1bd   :  { %1980 = shalt.err (!%p1977_p9)
}
 0x1be   :  { %1467 = dma.vmem_to_hbm [thread:$0]  %s1465_s18, 128, %s2070_s4, [#allocation4]  }
 0x1bf   :  { %1985 = dma.done.wait [#allocation4], 128  }
 0x1c0   :  { %1986 = vsyncadd [#allocation4], 4294967168 }
 0x1c1   :  { %1471 = vsyncpa [#allocation3], 1 }
 0x1c2   :  { %1472 = vsyncpa [#allocation6], 1 }
 0x1c3   :  { %1473 = vsyncpa [#allocation4], 1 }

</bundles_post_ra>
